<compile_context>
chip_gen: v7x
topology: tpu7x:2x2x1
jax: 0.10.0
libtpu: 0.0.40
codegen_flags: <defaults>
</compile_context>

<pallas_src>
import math
import jax
import jax.numpy as jnp
from jax.experimental import pallas as pl
from jax.experimental.pallas import tpu as pltpu

FREQ_DIM = 256          # frequency_embedding_size
HALF = FREQ_DIM // 2    # 128, lane-aligned
MAX_PERIOD = 10000.0


def _round_up(x, m):
    return (x + m - 1) // m * m


def _pick_tn(hidden, tn_max):
    """Hidden-column tile: largest multiple of 128 dividing `hidden` and <= tn_max.
    Falls back to the full hidden dim when hidden is small or not lane-aligned."""
    if hidden % 128 != 0 or hidden <= tn_max:
        return hidden
    best = 128
    tn = 128
    while tn <= tn_max:
        if hidden % tn == 0:
            best = tn
        tn += 128
    return best


def _make_kernel(fuse_k):
    def kernel(t_ref, freqs_ref, w1_ref, b1_ref, w2_ref, b2_ref, o_ref, h_ref):
        # ---- first Linear + SiLU: once per batch tile, reused for all W2 columns
        @pl.when(pl.program_id(1) == 0)
        def _():
            args = t_ref[...] * freqs_ref[...]            # (TM, HALF) f32, broadcast
            cos_e = jnp.cos(args)
            sin_e = jnp.sin(args)
            if fuse_k:
                # v6e/v7x: 256-deep MXU -> single K=256 dot (lane concat is cheap).
                emb = jnp.concatenate([cos_e, sin_e], axis=-1).astype(w1_ref.dtype)
                h = jnp.dot(emb, w1_ref[...], preferred_element_type=jnp.float32)
            else:
                # v5e: 128x128 MXU -> two K=128 dots, no concat materialized.
                h = jnp.dot(cos_e.astype(w1_ref.dtype), w1_ref[:HALF, :],
                            preferred_element_type=jnp.float32)
                h += jnp.dot(sin_e.astype(w1_ref.dtype), w1_ref[HALF:, :],
                             preferred_element_type=jnp.float32)
            h += b1_ref[...]
            h_ref[...] = h * jax.nn.sigmoid(h)            # SiLU, f32 on VPU/EUP

        # ---- second Linear: one (TM, H) x (H, TN) column block per grid step
        out = jnp.dot(h_ref[...].astype(w2_ref.dtype), w2_ref[...],
                      preferred_element_type=jnp.float32) + b2_ref[...]
        o_ref[...] = out.astype(o_ref.dtype)
    return kernel


def timestep_embedder(t, w1, b1, w2, b2, *,
                      compute_dtype=jnp.bfloat16,
                      out_dtype=jnp.float32,
                      tm_max=256,
                      tn_max=512,
                      fuse_k=None):
    """t: (N,); w1: (256, H) = W1.T; b1: (H,); w2: (H, H) = W2.T; b2: (H,).

    Returns (N, H) = Linear(H,H)(SiLU(Linear(256,H)(timestep_embedding(t, 256)))).
    """
    n = int(t.shape[0])
    hidden = int(w1.shape[1])
    assert w1.shape == (FREQ_DIM, hidden) and w2.shape == (hidden, hidden)
    assert b1.shape == (hidden,) and b2.shape == (hidden,)
    assert n >= 1

    if fuse_k is None:
        # v5e's 128-deep MXU is already saturated by K=128; keep split dots there.
        try:
            fuse_k = "v5" not in jax.devices()[0].device_kind.lower()
        except Exception:
            fuse_k = True

    # --- batch tiling: >=2 balanced tiles (megacore + minimal padded rows) -----
    num_tiles = max(2, pl.cdiv(n, tm_max))
    tm = _round_up(pl.cdiv(n, num_tiles), 8)
    n_pad = num_tiles * tm

    # --- hidden tiling: stream W2 / b2 / out as lane-aligned column blocks -----
    tn = _pick_tn(hidden, tn_max)
    h_grid = hidden // tn
    grid = (num_tiles, h_grid)

    # --- host-side prep ---------------------------------------------------------
    t2d = jnp.zeros((n_pad, 1), jnp.float32).at[:n, 0].set(t.astype(jnp.float32))
    freqs = jnp.exp((-math.log(MAX_PERIOD) / HALF)
                    * jnp.arange(HALF, dtype=jnp.float32)).reshape(1, HALF)
    w1c = w1.astype(compute_dtype)
    w2c = w2.astype(compute_dtype)
    b1r = b1.astype(jnp.float32).reshape(1, hidden)
    b2r = b2.astype(jnp.float32).reshape(1, hidden)

    in_specs = [
        pl.BlockSpec((tm, 1), lambda i, j: (i, 0)),             # t tile (streamed over i)
        pl.BlockSpec((1, HALF), lambda i, j: (0, 0)),           # freq table (resident)
        pl.BlockSpec((FREQ_DIM, hidden), lambda i, j: (0, 0)),  # W1 (resident)
        pl.BlockSpec((1, hidden), lambda i, j: (0, 0)),         # b1 (resident)
        pl.BlockSpec((hidden, tn), lambda i, j: (0, j)),        # W2 column block (streamed)
        pl.BlockSpec((1, tn), lambda i, j: (0, j)),             # b2 column block (streamed)
    ]
    out_specs = pl.BlockSpec((tm, tn), lambda i, j: (i, j))

    # --- VMEM budget: double-buffered blocks + scratch + elementwise temps ------
    cb = jnp.dtype(compute_dtype).itemsize
    ob = jnp.dtype(out_dtype).itemsize
    need = (
        2 * FREQ_DIM * hidden * cb              # W1 buffers
        + 2 * hidden * tn * cb                  # W2 column buffers
        + 4 * _round_up(hidden, 128) * 4        # b1 + b2 buffers (f32)
        + 2 * 8 * 128 * 4                       # freqs (lane/sublane padded)
        + 2 * tm * 128 * 4                      # t tiles (lane padded)
        + 2 * tm * tn * ob                      # out tiles
        + tm * hidden * 4                       # h scratch
        + tm * FREQ_DIM * (2 * 4 + cb)          # cos/sin temps + cast copy
        + tm * max(hidden, tn) * (4 + cb)       # first-layer / cast temps
    )
    try:
        vmem_cap = int(pltpu.get_tpu_info().vmem_capacity_bytes)
    except Exception:
        vmem_cap = 64 << 20                     # conservative (v7x per-TC) fallback
    vmem_limit = int(min(max(need + (8 << 20), 32 << 20), vmem_cap - (8 << 20)))

    cost = pl.CostEstimate(
        flops=2 * n * (FREQ_DIM * hidden + hidden * hidden),
        transcendentals=n * (FREQ_DIM + hidden),
        bytes_accessed=(FREQ_DIM * hidden + hidden * hidden) * cb
                       + 2 * hidden * 4 + HALF * 4
                       + n * (4 + hidden * ob),
    )

    out = pl.pallas_call(
        _make_kernel(fuse_k),
        out_shape=jax.ShapeDtypeStruct((n_pad, hidden), out_dtype),
        grid=grid,
        in_specs=in_specs,
        out_specs=out_specs,
        scratch_shapes=[pltpu.VMEM((tm, hidden), jnp.float32)],
        compiler_params=pltpu.CompilerParams(
            dimension_semantics=("parallel", "arbitrary"),
            vmem_limit_bytes=vmem_limit,
        ),
        cost_estimate=cost,
    )(t2d, freqs, w1c, b1r, w2c, b2r)
    return out[:n]


def reference(t, w1, b1, w2, b2):
    """Pure-JAX f32 reference matching the PyTorch module."""
    freqs = jnp.exp(-math.log(MAX_PERIOD)
                    * jnp.arange(HALF, dtype=jnp.float32) / HALF)
    args = t[:, None].astype(jnp.float32) * freqs[None]
    emb = jnp.concatenate([jnp.cos(args), jnp.sin(args)], axis=-1)
    h = emb @ w1 + b1
    h = h * jax.nn.sigmoid(h)
    return h @ w2 + b2


if __name__ == "__main__":
    key = jax.random.PRNGKey(0)
    k_t, k_w1, k_b1, k_w2, k_b2, k_t2 = jax.random.split(key, 6)

    def make_params(hidden, k1, kb1, k2, kb2):
        # parameters stored as (in, out), i.e. nn.Linear weight transposed
        w1 = jax.random.normal(k1, (FREQ_DIM, hidden), jnp.float32) / math.sqrt(FREQ_DIM)
        b1 = jax.random.normal(kb1, (hidden,), jnp.float32) * 0.02
        w2 = jax.random.normal(k2, (hidden, hidden), jnp.float32) / math.sqrt(hidden)
        b2 = jax.random.normal(kb2, (hidden,), jnp.float32) * 0.02
        return w1, b1, w2, b2

    # --- config 1: small lane-aligned hidden, tiny batch ------------------------
    HIDDEN = 128
    N = 8
    t = jax.random.uniform(k_t, (N,), jnp.float32, 0.0, 1000.0)
    w1, b1, w2, b2 = make_params(HIDDEN, k_w1, k_b1, k_w2, k_b2)
    ref = reference(t, w1, b1, w2, b2)

    out_f32 = jax.block_until_ready(
        timestep_embedder(t, w1, b1, w2, b2, compute_dtype=jnp.float32))
    assert out_f32.shape == (N, HIDDEN), out_f32.shape
    assert jnp.allclose(out_f32, ref, atol=1e-3, rtol=1e-3), \
        float(jnp.max(jnp.abs(out_f32 - ref)))

    out_bf = jax.block_until_ready(timestep_embedder(t, w1, b1, w2, b2))
    assert out_bf.shape == (N, HIDDEN), out_bf.shape
    assert jnp.allclose(out_bf, ref, atol=3e-2, rtol=3e-2), \
        float(jnp.max(jnp.abs(out_bf - ref)))

    # --- config 2: batch grid (2 x 152-row tiles) + hidden-column grid (2 blocks)
    HIDDEN2 = 256
    N2 = 300
    t2 = jax.random.uniform(k_t2, (N2,), jnp.float32, 0.0, 1000.0)
    w1b, b1b, w2b, b2b = make_params(HIDDEN2, k_b1, k_w2, k_b2, k_w1)
    ref2 = reference(t2, w1b, b1b, w2b, b2b)
    out2 = jax.block_until_ready(
        timestep_embedder(t2, w1b, b1b, w2b, b2b, tn_max=128))
    assert out2.shape == (N2, HIDDEN2), out2.shape
    assert jnp.allclose(out2, ref2, atol=3e-2, rtol=3e-2), \
        float(jnp.max(jnp.abs(out2 - ref2)))

    # --- config 3: non-128-multiple hidden (e.g. hidden_size('mlp') = 120) ------
    HIDDEN3 = 120
    N3 = 5
    t3 = jax.random.uniform(jax.random.PRNGKey(3), (N3,), jnp.float32, 0.0, 1000.0)
    w1d, b1d, w2d, b2d = make_params(HIDDEN3, k_w2, k_b2, k_w1, k_b1)
    ref3 = reference(t3, w1d, b1d, w2d, b2d)
    out3 = jax.block_until_ready(
        timestep_embedder(t3, w1d, b1d, w2d, b2d, compute_dtype=jnp.float32))
    assert out3.shape == (N3, HIDDEN3), out3.shape
    assert jnp.allclose(out3, ref3, atol=1e-3, rtol=1e-3), \
        float(jnp.max(jnp.abs(out3 - ref3)))

    print("KERNEL_OK")
</pallas_src>

<mosaic_0001>
module attributes {stable_mosaic.version = 11 : i64} {
  func.func @kernel(%arg0: i32, %arg1: i32, %arg2: memref<8x1xf32, #tpu.memory_space<vmem>>, %arg3: memref<1x128xf32, #tpu.memory_space<vmem>>, %arg4: memref<256x128xf32, #tpu.memory_space<vmem>>, %arg5: memref<1x128xf32, #tpu.memory_space<vmem>>, %arg6: memref<128x128xf32, #tpu.memory_space<vmem>>, %arg7: memref<1x128xf32, #tpu.memory_space<vmem>>, %arg8: memref<8x128xf32, #tpu.memory_space<vmem>>, %arg9: memref<8x128xf32, #tpu.memory_space<vmem>>) attributes {dimension_semantics = [#tpu.dimension_semantics<parallel>, #tpu.dimension_semantics<arbitrary>], iteration_bounds = array<i64: 2, 1>, scalar_prefetch = 0 : i64, scratch_operands = 1 : i64, tpu.core_type = #tpu.core_type<tc>, window_params = [{transform_indices = @transform_0, window_bounds = array<i64: 8, 1>}, {pipeline_mode = #tpu.pipeline_mode<synchronous>, transform_indices = @transform_1, window_bounds = array<i64: 1, 128>}, {pipeline_mode = #tpu.pipeline_mode<synchronous>, transform_indices = @transform_2, window_bounds = array<i64: 256, 128>}, {pipeline_mode = #tpu.pipeline_mode<synchronous>, transform_indices = @transform_3, window_bounds = array<i64: 1, 128>}, {transform_indices = @transform_4, window_bounds = array<i64: 128, 128>}, {transform_indices = @transform_5, window_bounds = array<i64: 1, 128>}, {transform_indices = @transform_6, window_bounds = array<i64: 8, 128>}]} {
    %c0_i32 = arith.constant 0 : i32
    %0 = arith.cmpi eq, %arg1, %c0_i32 : i32
    %1 = arith.extui %0 : i1 to i32
    %c0_i32_0 = arith.constant 0 : i32
    %2 = arith.cmpi ne, %1, %c0_i32_0 : i32
    scf.if %2 {
      %c0_8 = arith.constant 0 : index
      %c0_9 = arith.constant 0 : index
      %10 = vector.load %arg2[%c0_8, %c0_9] : memref<8x1xf32, #tpu.memory_space<vmem>>, vector<8x1xf32>
      %c0_10 = arith.constant 0 : index
      %c0_11 = arith.constant 0 : index
      %11 = vector.load %arg3[%c0_10, %c0_11] : memref<1x128xf32, #tpu.memory_space<vmem>>, vector<1x128xf32>
      %12 = vector.broadcast %10 : vector<8x1xf32> to vector<8x128xf32>
      %13 = vector.broadcast %11 : vector<1x128xf32> to vector<8x128xf32>
      %14 = arith.mulf %12, %13 : vector<8x128xf32>
      %15 = math.cos %14 : vector<8x128xf32>
      %16 = math.sin %14 : vector<8x128xf32>
      %17 = tpu.concatenate %15, %16 in 1 : vector<8x128xf32>, vector<8x128xf32> -> vector<8x256xf32>
      %c0_12 = arith.constant 0 : index
      %c0_13 = arith.constant 0 : index
      %18 = vector.load %arg4[%c0_12, %c0_13] : memref<256x128xf32, #tpu.memory_space<vmem>>, vector<256x128xf32>
      %cst_14 = arith.constant dense<0.000000e+00> : vector<8x128xf32>
      %19 = tpu.matmul %17, %18, %cst_14 {dimension_numbers = #tpu.dot_dimension_numbers<[1], [0], [0], [1], [0, 0, 1, 1], [], []>} : vector<8x256xf32>, vector<256x128xf32>, vector<8x128xf32> -> vector<8x128xf32>
      %c0_15 = arith.constant 0 : index
      %c0_16 = arith.constant 0 : index
      %20 = vector.load %arg5[%c0_15, %c0_16] : memref<1x128xf32, #tpu.memory_space<vmem>>, vector<1x128xf32>
      %21 = vector.broadcast %20 : vector<1x128xf32> to vector<8x128xf32>
      %22 = arith.addf %19, %21 : vector<8x128xf32>
      %23 = arith.negf %22 : vector<8x128xf32>
      %24 = math.exp %23 : vector<8x128xf32>
      %cst_17 = arith.constant 1.000000e+00 : f32
      %25 = vector.broadcast %cst_17 : f32 to vector<8x128xf32>
      %26 = arith.addf %25, %24 : vector<8x128xf32>
      %27 = arith.divf %25, %26 : vector<8x128xf32>
      %28 = arith.mulf %22, %27 : vector<8x128xf32>
      %c0_18 = arith.constant 0 : index
      %c0_19 = arith.constant 0 : index
      %29 = vector.load %arg9[%c0_18, %c0_19] : memref<8x128xf32, #tpu.memory_space<vmem>>, vector<8x128xf32>
      tpu.vector_store %arg9[%c0_18, %c0_19], %28 {strides = array<i32>} : memref<8x128xf32, #tpu.memory_space<vmem>>, vector<8x128xf32>,
    } else {
    }
    %c0 = arith.constant 0 : index
    %c0_1 = arith.constant 0 : index
    %3 = vector.load %arg9[%c0, %c0_1] : memref<8x128xf32, #tpu.memory_space<vmem>>, vector<8x128xf32>
    %c0_2 = arith.constant 0 : index
    %c0_3 = arith.constant 0 : index
    %4 = vector.load %arg6[%c0_2, %c0_3] : memref<128x128xf32, #tpu.memory_space<vmem>>, vector<128x128xf32>
    %cst = arith.constant dense<0.000000e+00> : vector<8x128xf32>
    %5 = tpu.matmul %3, %4, %cst {dimension_numbers = #tpu.dot_dimension_numbers<[1], [0], [0], [1], [0, 0, 1, 1], [], []>} : vector<8x128xf32>, vector<128x128xf32>, vector<8x128xf32> -> vector<8x128xf32>
    %c0_4 = arith.constant 0 : index
    %c0_5 = arith.constant 0 : index
    %6 = vector.load %arg7[%c0_4, %c0_5] : memref<1x128xf32, #tpu.memory_space<vmem>>, vector<1x128xf32>
    %7 = vector.broadcast %6 : vector<1x128xf32> to vector<8x128xf32>
    %8 = arith.addf %5, %7 : vector<8x128xf32>
    %c0_6 = arith.constant 0 : index
    %c0_7 = arith.constant 0 : index
    %9 = vector.load %arg8[%c0_6, %c0_7] : memref<8x128xf32, #tpu.memory_space<vmem>>, vector<8x128xf32>
    tpu.vector_store %arg8[%c0_6, %c0_7], %8 {strides = array<i32>} : memref<8x128xf32, #tpu.memory_space<vmem>>, vector<8x128xf32>,
    return
  }
  func.func @transform_0(%arg0: i32, %arg1: i32) -> (i32, i32) {
    %c0_i32 = arith.constant 0 : i32
    %c0_i32_0 = arith.constant 0 : i32
    return %arg0, %c0_i32 : i32, i32
  }
  func.func @transform_1(%arg0: i32, %arg1: i32) -> (i32, i32) {
    %c0_i32 = arith.constant 0 : i32
    %c0_i32_0 = arith.constant 0 : i32
    %c0_i32_1 = arith.constant 0 : i32
    return %c0_i32, %c0_i32_0 : i32, i32
  }
  func.func @transform_2(%arg0: i32, %arg1: i32) -> (i32, i32) {
    %c0_i32 = arith.constant 0 : i32
    %c0_i32_0 = arith.constant 0 : i32
    %c0_i32_1 = arith.constant 0 : i32
    return %c0_i32, %c0_i32_0 : i32, i32
  }
  func.func @transform_3(%arg0: i32, %arg1: i32) -> (i32, i32) {
    %c0_i32 = arith.constant 0 : i32
    %c0_i32_0 = arith.constant 0 : i32
    %c0_i32_1 = arith.constant 0 : i32
    return %c0_i32, %c0_i32_0 : i32, i32
  }
  func.func @transform_4(%arg0: i32, %arg1: i32) -> (i32, i32) {
    %c0_i32 = arith.constant 0 : i32
    %c0_i32_0 = arith.constant 0 : i32
    return %c0_i32, %arg1 : i32, i32
  }
  func.func @transform_5(%arg0: i32, %arg1: i32) -> (i32, i32) {
    %c0_i32 = arith.constant 0 : i32
    %c0_i32_0 = arith.constant 0 : i32
    return %c0_i32, %arg1 : i32, i32
  }
  func.func @transform_6(%arg0: i32, %arg1: i32) -> (i32, i32) {
    %c0_i32 = arith.constant 0 : i32
    return %arg0, %arg1 : i32, i32
  }
}

</mosaic_0001>

<bundles_post_ra>
// kernel: tpu_custom_call.1
= control target key start
LH: loop header
LB: loop body
LE: loop exit
PB: predicated region body
PF: predicated region fallthrough
CT: control target
= control target key end

     0   :  { %11 = vsyncpa [#allocation4], 0  ;;  %s1551_s0 = inlined_call_operand.vmem [shape: f32[16,1], index: 0, kind: input, shape index: {}]   ;;  %s1552_s1 = inlined_call_operand.vmem [shape: f32[1,128], index: 1, kind: input, shape index: {}]   ;;  %s1553_s2 = inlined_call_operand.hbm [shape: f32[256,128], index: 2, kind: input, shape index: {}]   ;;  %s1554_s3 = inlined_call_operand.vmem [shape: f32[1,128], index: 3, kind: input, shape index: {}]   ;;  %s1555_s4 = inlined_call_operand.hbm [shape: f32[128,128], index: 4, kind: input, shape index: {}]   ;;  %s1556_s5 = inlined_call_operand.vmem [shape: f32[1,128], index: 5, kind: input, shape index: {}]   ;;  %s1557_s6 = inlined_call_operand.hbm [shape: f32[16,128], index: 6, kind: output, shape index: {}]  }
   0x1   :  { %12 = vsyncpa [#allocation7], 0 }
   0x2   :  { %13 = vsyncpa [#allocation5], 0 }
   0x3   :  { %15 = vsyncpa [#allocation5 + $0x1], 0  ;;  %s1334_s21 = smov 0   ;;  %s1336_s22 = smov 0  }
   0x4   :  { %s1338_s23 = smov 0   ;;  %s1340_s24 = smov 0  }
   0x5   :  { %s1342_s25 = smov 0   ;;  %s1344_s26 = smov 0  }
   0x6 LB: > { %1564 = sst [smem:[#allocation12_spill]] %s1278_s25  ;;  %s868_s27 = sadd.s32 4294967295, %s1282_s26   ;;  %s1282_s26 = sphi %s1344_s26, %s21_s26   ;;  %s1278_s25 = sphi %s1342_s25, %s1576_s25   ;;  %s1274_s24 = sphi %s1340_s24, %s1575_s24   ;;  %s1270_s23 = sphi %s1338_s23, %s1579_s23   ;;  %s1266_s22 = sphi %s1336_s22, %s1578_s22   ;;  %s1262_s21 = sphi %s1334_s21, %s1577_s21  }
   0x7   : > { %s869_s28 = sadd.s32 4294967294, %s1282_s26   ;;  %s33_s29 = sadd.s32 1, %s1278_s25 }
   0x8   : > { %s183_s30 = sadd.s32 1, %s1270_s23  ;;  %p35_p0 = scmp.ge.s32.totalorder %s33_s29, 2 }
   0x9   : > { %p193_p1 = scmp.ne.s32.totalorder %s1270_s23, %s1266_s22  ;;  %p194_p2 = scmp.eq.s32.totalorder %s868_s27, 1 }
   0xa   : > { %p199_p3 = scmp.ne.s32.totalorder %s1266_s22, %s1262_s21  ;;  %s1581_s29 = smov (%p35_p0, %s33_s29), 0 }
   0xb   : > { %1565 = sst [smem:[#allocation13_spill]] %s1581_s29  ;;  %p1374_p4 = por %p194_p2, %p193_p1 }
   0xc   : > { %p200_p5 = scmp.eq.s32.totalorder %s869_s28, 1  ;;  %s178_s8 = ssub.s32 %s1278_s25, %s1581_s29 }
   0xd   : > { %s1566_s7 = scalar_select %p1374_p4, 1, 0 }
   0xe   : > { %p870_p6 = scmp.ge.s32.totalorder %s1282_s26, 1  ;;  %p181_p7 = scmp.eq.s32.totalorder %s178_s8, 0 }
   0xf   : > { %p1381_p8 = por %p200_p5, %p199_p3  ;;  %p207_p9 = scmp.lt.s32.totalorder %s1282_s26, 3 }
  0x10   : > { %s1387_s10 = scalar_select %p181_p7, %s1270_s23, %s183_s30  }
  0x11   : > { %s1567_s9 = scalar_select %p1381_p8, 1, 0 }
  0x12   : > { %p1389_p10 = pnand %p870_p6, %p207_p9  ;;  %p1393_p11 = scmp.eq.s32.totalorder %s868_s27, 0 }
  0x13   : > { %s1284_s13 = smov [#allocation3]   ;;  %s1285_s16 = smov [#allocation6]  }
  0x14   : > { %s1568_s11 = scalar_select %p1389_p10, 1, 0 }
  0x15   : > { %s1569_s12 = scalar_select %p1393_p11, 1, 0 }
  0x16   : > { %p1053_p12 = pneg %p1389_p10  ;;  %s222_s14 = sshll.u32 %s1284_s13, 4  ;;  %s223_s14 = int_to_ptr.vmem [resolvable:$true] %s222_s14 }
  0x17   : > { %s240_s17 = sshll.u32 %s1285_s16, 4  ;;  %s1140_s20 = scalar_lea.hbm %s1553_s2, 4096  ;;  %s1405_s17 = int_to_ptr.vmem [resolvable:$true] %s240_s17 }
  0x18   : > { %p1401_p13 = pnand %p1393_p11, %p1053_p12  ;;  %p1141_p0 = scmp.ne.s32.totalorder %s1553_s2, %s1140_s20 }
  0x19   : > { %p1147_p5 = scmp.lt.u32.totalorder %s1140_s20, %s1553_s2 }
  0x1a   : > { %p1142_p1 = pneg %p1401_p13 }
  0x1c   : > { %p1143_p2 = pnand %p1142_p1, %p1141_p0 }
  0x1e   : > { %p1144_p3 = pneg %p1143_p2 }
  0x20   : > { %p1149_p6 = pnand %p1147_p5, %p1144_p3 }
  0x22   : > { %1152 = shalt.err (!%p1149_p6)
}
  0x23   : > { %s1153_s13 = scalar_lea.vmem %s223_s14, 4096  ;;  %p1161_p8 = scmp.lt.s32.totalorder %s223_s14, %s223_s14 }
  0x24   : > { %p1154_p7 = scmp.ne.s32.totalorder %s223_s14, %s1153_s13  ;;  %p1162_p4 = scmp.lt.s32.totalorder %s1153_s13, %s1153_s13 }
  0x26   : > { %p1156_p9 = pnand %p1154_p7, %p1142_p1  ;;  %p1163_p11 = por %p1162_p4, %p1161_p8 }
  0x28   : > { %p1157_p12 = pneg %p1156_p9 }
  0x2a   : > { %p1164_p10 = pnand %p1163_p11, %p1157_p12 }
  0x2c   : > { %1167 = shalt.err (!%p1164_p10)
}
  0x2d   : > { %s1286_s16 = smov 128   ;;  %s1287_s18 = smov 8  }
  0x2e   : > { %1056 = dma.hbm_to_vmem [thread:$0]  (!%p1401_p13), %s1553_s2, 4096, %s223_s14, [#allocation4], %s1286_s16, %s1286_s16, %s1287_s18  }
  0x2f   : > { %s1168_s30 = scalar_lea.hbm %s1555_s4, 2048 }
  0x30   : > { %p1169_p0 = scmp.ne.s32.totalorder %s1555_s4, %s1168_s30  ;;  %p1175_p10 = scmp.lt.u32.totalorder %s1168_s30, %s1555_s4 }
  0x32   : > { %p1171_p4 = pnand %p1169_p0, %p1142_p1 }
  0x34   : > { %p1172_p8 = pneg %p1171_p4 }
  0x36   : > { %p1177_p11 = pnand %p1175_p10, %p1172_p8 }
  0x38   : > { %1180 = shalt.err (!%p1177_p11)
}
  0x39   : > { %s1181_s14 = scalar_lea.vmem %s1405_s17, 2048  ;;  %p1189_p6 = scmp.lt.s32.totalorder %s1405_s17, %s1405_s17 }
  0x3a   : > { %p1182_p2 = scmp.ne.s32.totalorder %s1405_s17, %s1181_s14  ;;  %p1190_p7 = scmp.lt.s32.totalorder %s1181_s14, %s1181_s14 }
  0x3c   : > { %p1184_p3 = pnand %p1182_p2, %p1142_p1  ;;  %p1191_p9 = por %p1190_p7, %p1189_p6 }
  0x3e   : > { %p1185_p5 = pneg %p1184_p3 }
  0x40   : > { %p1192_p12 = pnand %p1191_p9, %p1185_p5 }
  0x42   : > { %1195 = shalt.err (!%p1192_p12)
}
  0x43   : > { %1059 = dma.hbm_to_vmem [thread:$0]  (!%p1401_p13), %s1555_s4, 2048, %s1405_s17, [#allocation7], %s1286_s16, %s1286_s16, %s1287_s18  }
  0x44   : > { %p1571_p0 = scmp.ne.s32.totalorder %s1568_s11, 0 }
  0x45   : > { %p1572_p4 = scmp.ne.s32.totalorder (!%p1571_p0), %s1569_s12, 0 }
  0x46   : > { %269 = sbr.rel (%p1571_p0) target bundleno = 770 (0x302), region = 44 }
  0x4d   : > { %1249 = dma.done.wait (%p1572_p4), [#allocation4], 4096  }
  0x4e   : > { %1251 = vsyncadd (%p1572_p4), [#allocation4], 4294963200 }
  0x4f   : > { %1253 = dma.done.wait (%p1572_p4), [#allocation7], 2048  }
  0x50   : > { %1255 = vsyncadd (%p1572_p4), [#allocation7], 4294965248  ;;  %p305_p1 = scmp.lt.s32.totalorder %s1274_s24, 1  ;;  %v1288_v0 = vmov 0   ;;  %v553_v2 = vld [vmem:[#allocation3 + $0x80] sm:$0xff]  ;;  %v554_v3 = vld [vmem:[#allocation3 + $0x88] sm:$0xff] }
  0x51   : > { %1131 = vset.pattern.permute.xlu0 %v1288_v0  ;;  %v537_v4 = vld [vmem:[#allocation3] sm:$0xff]  ;;  %v983_v5 = vpack.c.bf16 %v554_v3, %v553_v2  ;;  %v538_v6 = vld [vmem:[#allocation3 + $0x8] sm:$0xff]  ;;  %v555_v7 = vld [vmem:[#allocation3 + $0x90] sm:$0xff]  ;;  %v1289_v0 = vmov 2102212464   ;;  %s302_s28 = sand.u32 1, %s1266_s22  }
  0x52   : > { %s306_s15 = scalar_select %p305_p1, %s1274_s24, 1  ;;  %v556_v8 = vld [vmem:[#allocation3 + $0x98] sm:$0xff]  ;;  %v985_v9 = vpack.c.bf16 %v538_v6, %v537_v4  ;;  %v539_v11 = vld [vmem:[#allocation3 + $0x10] sm:$0xff]  ;;  %v557_v13 = vld [vmem:[#allocation3 + $0xa0] sm:$0xff]  ;;  %v1290_v2 = vmov 920167782  }
  0x53   : > { %v987_v10 = vpack.c.bf16 %v556_v8, %v555_v7  ;;  %v540_v12 = vld [vmem:[#allocation3 + $0x18] sm:$0xff]  ;;  %984 = vmatprep.subr.bf16.mxu0 %v983_v5  ;;  %v558_v14 = vld [vmem:[#allocation3 + $0xa8] sm:$0xff]  ;;  %v541_v17 = vld [vmem:[#allocation3 + $0x20] sm:$0xff]  ;;  %v1291_v6 = vmov 1326507024   ;;  %s878_s30 = sshll.u32 %s302_s28, 3 }
  0x54   : > { %s879_s11 = sshll.u32 %s306_s15, 3  ;;  %986 = vmatpush3.bf16.msra.mxu0 %v985_v9  ;;  %v989_v15 = vpack.c.bf16 %v540_v12, %v539_v11  ;;  %v991_v16 = vpack.c.bf16 %v558_v14, %v557_v13  ;;  %v542_v18 = vld [vmem:[#allocation3 + $0x28] sm:$0xff]  ;;  %v559_v19 = vld [vmem:[#allocation3 + $0xb0] sm:$0xff]  ;;  %v560_v20 = vld [vmem:[#allocation3 + $0xb8] sm:$0xff]  ;;  %v1292_v8 = vmov 683565275  }
  0x55   : > { %s308_s18 = scalar_lea.vmem %s1551_s0, %s879_s11  ;;  %988 = vmatprep.subr.bf16.mxu0 %v987_v10  ;;  %v993_v21 = vpack.c.bf16 %v542_v18, %v541_v17  ;;  %v995_v22 = vpack.c.bf16 %v560_v20, %v559_v19  ;;  %v543_v23 = vld [vmem:[#allocation3 + $0x30] sm:$0xff]  ;;  %v544_v24 = vld [vmem:[#allocation3 + $0x38] sm:$0xff]  ;;  %v561_v25 = vld [vmem:[#allocation3 + $0xc0] sm:$0xff]  ;;  %v1293_v10 = vmov 2475754826   ;;  %s893_s14 = sshll.u32 %s1274_s24, 7 }
  0x56   : > { %v316_v1 = vld [vmem:[%s308_s18] sm:$0xff]  ;;  %v562_v26 = vld [vmem:[#allocation3 + $0xc8] sm:$0xff]  ;;  %v997_v27 = vpack.c.bf16 %v544_v24, %v543_v23  ;;  %v563_v31 = vld [vmem:[#allocation3 + $0xd0] sm:$0xff]  ;;  %v1294_v13 = vmov 2131351028   ;;  %s304_s25 = scalar_lea.vmem [#allocation8], %s878_s30  ;;  %s1504_s17 = scalar_lea.hbm %s1557_s6, %s893_s14 }
  0x57   : > { %320 = vperm.xlu0 %1131, %v316_v1   ;;  %v999_v28 = vpack.c.bf16 %v562_v26, %v561_v25  ;;  %v545_v29 = vld [vmem:[#allocation3 + $0x40] sm:$0xff]  ;;  %v546_v30 = vld [vmem:[#allocation3 + $0x48] sm:$0xff]  ;;  %v564_v32 = vld [vmem:[#allocation3 + $0xd8] sm:$0xff]  ;;  %s764_s29 = sshll.u32 %s304_s25, 4  ;;  %s750_s16 = scalar_lea.sflag [#allocation5], %s302_s28  ;;  %s1506_s29 = int_to_ptr.vmem [resolvable:$true] %s764_s29 }
  0x58   : > { %990 = vmatpush3.bf16.msra.mxu0 %v989_v15  ;;  %v1001_v33 = vpack.c.bf16 %v546_v30, %v545_v29  ;;  %v1003_v34 = vpack.c.bf16 %v564_v32, %v563_v31  ;;  %v547_v35 = vld [vmem:[#allocation3 + $0x50] sm:$0xff]  ;;  %v548_v36 = vld [vmem:[#allocation3 + $0x58] sm:$0xff]  ;;  %v565_v37 = vld [vmem:[#allocation3 + $0xe0] sm:$0xff]  ;;  %s1196_s18 = scalar_lea.vmem %s1506_s29, 128  ;;  %p1573_p8 = scmp.ne.s32.totalorder %s1566_s7, 0 }
  0x59   : > { %992 = vmatprep.subr.bf16.mxu0 %v991_v16  ;;  %v566_v38 = vld [vmem:[#allocation3 + $0xe8] sm:$0xff]  ;;  %v1005_v39 = vpack.c.bf16 %v548_v36, %v547_v35  ;;  %v549_v41 = vld [vmem:[#allocation3 + $0x60] sm:$0xff]  ;;  %v567_v43 = vld [vmem:[#allocation3 + $0xf0] sm:$0xff]  ;;  %p1197_p13 = scmp.ne.s32.totalorder %s1506_s29, %s1196_s18  ;;  %s1298_s24 = smov [#allocation8]  }
  0x5a   : > { %v1007_v40 = vpack.c.bf16 %v566_v38, %v565_v37  ;;  %v550_v42 = vld [vmem:[#allocation3 + $0x68] sm:$0xff]  ;;  %v568_v44 = vld [vmem:[#allocation3 + $0xf8] sm:$0xff]  ;;  %v551_v47 = vld [vmem:[#allocation3 + $0x70] sm:$0xff]  ;;  %s1200_s12 = sshll.u32 %s1298_s24, 4  ;;  %s1201_s12 = int_to_ptr.vmem [resolvable:$false] %s1200_s12 }
  0x5b   : > { %v1009_v45 = vpack.c.bf16 %v550_v42, %v549_v41  ;;  %v1011_v46 = vpack.c.bf16 %v568_v44, %v567_v43  ;;  %v552_v48 = vld [vmem:[#allocation3 + $0x78] sm:$0xff]  ;;  %v880_v50 = vld [vmem:[%s1552_s1] ss:$0 sm:$0xff]  ;;  %p1198_p10 = pnand %p1197_p13, %p1573_p8  ;;  %s1202_s19 = scalar_lea.vmem %s1201_s12, 256 }
  0x5c   : > { %994 = vmatpush3.bf16.msra.mxu0 %v993_v21  ;;  %v1013_v49 = vpack.c.bf16 %v552_v48, %v551_v47  ;;  %p1203_p2 = scmp.lt.s32.totalorder %s1506_s29, %s1201_s12  ;;  %p1204_p3 = scmp.lt.s32.totalorder %s1202_s19, %s1196_s18 }
  0x5d   : > { %996 = vmatprep.subr.bf16.mxu0 %v995_v22  ;;  %p1199_p11 = pneg %p1198_p10 }
  0x5e   : > { %p1205_p5 = por %p1204_p3, %p1203_p2 }
  0x60   : > { %998 = vmatpush3.bf16.msra.mxu0 %v997_v27  ;;  %p1206_p6 = pnand %p1205_p5, %p1199_p11 }
  0x61   : > { %1000 = vmatprep.subr.bf16.mxu0 %v999_v28 }
  0x64   : > { %1002 = vmatpush3.bf16.msra.mxu0 %v1001_v33 }
  0x65   : > { %1004 = vmatprep.subr.bf16.mxu0 %v1003_v34 }
  0x68   : > { %1006 = vmatpush3.bf16.msra.mxu0 %v1005_v39 }
  0x69   : > { %1008 = vmatprep.subr.bf16.mxu0 %v1007_v40 }
  0x6c   : > { %1010 = vmatpush3.bf16.msra.mxu0 %v1009_v45 }
  0x6d   : > { %1012 = vmatprep.subr.bf16.mxu0 %v1011_v46 }
  0x70   : > { %1014 = vmatpush3.bf16.msra.mxu0 %v1013_v49 }
  0xd6   : > { %v321_v51 = vpop.permute.xlu0 %320 }
  0xd7   : > { %v1472_v52 = vmul.f32 %v880_v50, %v321_v51 }
  0xd9   : > { %v333_v53 = vand.u32 2139095040, %v1472_v52  ;;  %v330_v54 = vand.u32 2147483647, %v1472_v52  ;;  %vm332_vm7 = vcmp.lt.s32.totalorder %v1472_v52, 0  ;;  %vm422_vm15 = vweird.f32 %v1472_v52 }
  0xdb   : > { %v334_v55 = vshrl.u32 %v333_v53, 23  ;;  %v337_v57 = vand.u32 8388607, %v330_v54  ;;  %vm331_vm8 = vcmp.le.f32.partialorder %v330_v54, 0.7853982 }
  0xdd   : > { %v881_v56 = vadd.s32 4294967169, %v334_v55  ;;  %v338_v60 = vor.u32 8388608, %v337_v57 }
  0xdf   : > { %v340_v58 = vadd.s32 1, %v881_v56  ;;  %v378_v4 = vshll.u32 %v338_v60, 8 }
  0xe1   : > { %vm341_vm0 = vcmp.gt.s32.totalorder %v340_v58, 0 }
  0xe2   : > { %v342_v59 = vsel %vm341_vm0, %v340_v58, 0  ;;  %vm1296_vm0 = vmmov 0  }
  0xe3   : > { %v344_v61 = vand.u32 31, %v342_v59  ;;  %v343_v62 = vshrl.u32 %v342_v59, 5 }
  0xe5   : > { %v345_v63 = vsub.s32 32, %v344_v61  ;;  %v356_v1 = vshll.u32 %v1289_v0, %v344_v61  ;;  %v359_v3 = vshll.u32 %v1290_v2, %v344_v61  ;;  %v347_v9 = vshll.u32 %v1292_v8, %v344_v61 }
  0xe6   : > { %v350_v12 = vshll.u32 %v1293_v10, %v344_v61  ;;  %v353_v15 = vshll.u32 %v1294_v13, %v344_v61  ;;  %vm365_vm1 = vcmp.lt.s32.totalorder %v343_v62, 4  ;;  %vm362_vm2 = vcmp.lt.s32.totalorder %v343_v62, 1 }
  0xe7   : > { %v357_v5 = vshrl.u32 %v1290_v2, %v345_v63  ;;  %v360_v7 = vshrl.u32 %v1291_v6, %v345_v63  ;;  %v348_v11 = vshrl.u32 %v1293_v10, %v345_v63  ;;  %v351_v14 = vshrl.u32 %v1294_v13, %v345_v63 }
  0xe8   : > { %v354_v16 = vshrl.u32 %v1289_v0, %v345_v63  ;;  %v346_v20 = vshrl.u32 %v1292_v8, %v345_v63  ;;  %vm363_vm3 = vcmp.lt.s32.totalorder %v343_v62, 2  ;;  %vm364_vm4 = vcmp.lt.s32.totalorder %v343_v62, 3 }
  0xe9   : > { %v358_v17 = vor.u32 %v357_v5, %v356_v1  ;;  %v361_v18 = vor.u32 %v360_v7, %v359_v3  ;;  %v349_v19 = vor.u32 %v348_v11, %v347_v9  ;;  %v352_v21 = vor.u32 %v351_v14, %v350_v12 }
  0xea   : > { %v355_v22 = vor.u32 %v354_v16, %v353_v15 }
  0xeb   : > { %v371_v23 = vsel %vm365_vm1, %v358_v17, 920167782  ;;  %v375_v24 = vsel %vm365_vm1, %v361_v18, 1326507024  ;;  %v370_v26 = vsel %vm362_vm2, %v349_v19, %v352_v21  ;;  %v366_v29 = vsel %vm362_vm2, %v346_v20, %v349_v19 }
  0xec   : > { %v367_v25 = vsel %vm365_vm1, %v355_v22, 2102212464  ;;  %v372_v27 = vsel %vm364_vm4, %v355_v22, %v371_v23  ;;  %v374_v28 = vsel %vm362_vm2, %v352_v21, %v355_v22  ;;  %v376_v32 = vsel %vm364_vm4, %v358_v17, %v375_v24  ;;  %v655_v22 = vld [vmem:[#allocation6] sm:$0xff]  ;;  %v656_v23 = vld [vmem:[#allocation6 + $0x8] sm:$0xff] }
  0xed   : > { %v368_v30 = vsel %vm364_vm4, %v352_v21, %v367_v25  ;;  %v373_v31 = vsel %vm363_vm3, %v370_v26, %v372_v27  ;;  %v377_v33 = vsel %vm363_vm3, %v374_v28, %v376_v32  ;;  %v1016_v24 = vpack.c.bf16 %v656_v23, %v655_v22  ;;  %v657_v26 = vld [vmem:[#allocation6 + $0x10] sm:$0xff]  ;;  %v658_v27 = vld [vmem:[#allocation6 + $0x18] sm:$0xff] }
  0xee   : > { %v1478_v34 = vmul.u32.u64.low %v378_v4, %v373_v31  ;;  %v1479_v35 = vmul.u32.u64.high %v378_v4, %v373_v31, %v1478_v34  ;;  %v1481_v36 = vmul.u32.u64.low %v378_v4, %v377_v33  ;;  %v1482_v37 = vmul.u32.u64.high %v378_v4, %v377_v33, %v1481_v36  ;;  %v661_v31 = vld [vmem:[#allocation6 + $0x30] sm:$0xff]  ;;  %v662_v32 = vld [vmem:[#allocation6 + $0x38] sm:$0xff] }
  0xef   : > { %v369_v38 = vsel %vm363_vm3, %v366_v29, %v368_v30  ;;  %v1295_v25 = vmov 0.0|0.0   ;;  %v1019_v28 = vpack.c.bf16 %v658_v27, %v657_v26  ;;  %v659_v29 = vld [vmem:[#allocation6 + $0x20] sm:$0xff]  ;;  %v1025_v33 = vpack.c.bf16 %v662_v32, %v661_v31 }
  0xf0   : > { %v388_v39 = vadd.s32 1, %v1479_v35  ;;  %v385_v40 = vmul.u32 %v378_v4, %v369_v38  ;;  %vm387_vm5 = vc.u32 %v1482_v37, %v1478_v34  ;;  %v386_v53 = vadd.s32 %v1478_v34, %v1482_v37  ;;  %1015 = vmatprep.subr.bf16.mxu1 %v1295_v25  ;;  %v663_v34 = vld [vmem:[#allocation6 + $0x40] sm:$0xff]  ;;  %v665_v37 = vld [vmem:[#allocation6 + $0x50] sm:$0xff]  ;;  %v666_v38 = vld [vmem:[#allocation6 + $0x58] sm:$0xff] }
  0xf1   : > { %1017 = vmatpush3.bf16.msra.mxu1 %v1016_v24 }
  0xf2   : > { %v389_v41 = vsel %vm387_vm5, %v388_v39, %v1479_v35  ;;  %1018 = vmatprep.subr.bf16.mxu1 %v1295_v25  ;;  %v664_v35 = vld [vmem:[#allocation6 + $0x48] sm:$0xff]  ;;  %v1031_v39 = vpack.c.bf16 %v666_v38, %v665_v37 }
  0xf3   : > { %v390_v42 = vadd.s32 %v389_v41, %v385_v40  ;;  %v1028_v36 = vpack.c.bf16 %v664_v35, %v663_v34  ;;  %v667_v40 = vld [vmem:[#allocation6 + $0x60] sm:$0xff]  ;;  %v668_v41 = vld [vmem:[#allocation6 + $0x68] sm:$0xff] }
  0xf5   : > { %v391_v43 = vadd.s32 536870912, %v390_v42  ;;  %1020 = vmatpush3.bf16.msra.mxu1 %v1019_v28 }
  0xf6   : > { %1021 = vmatprep.subr.bf16.mxu1 %v1295_v25 }
  0xf7   : > { %v392_v44 = vshrl.u32 %v391_v43, 30  ;;  %v1034_v43 = vpack.c.bf16 %v668_v41, %v667_v40 }
  0xf9   : > { %v393_v45 = vshll.u32 %v392_v44, 30  ;;  %v416_v2 = vsub.s32 4, %v392_v44 }
  0xfb   : > { %v394_v46 = vsub.s32 %v390_v42, %v393_v45  ;;  %v417_v5 = vsel %vm332_vm7, %v416_v2, %v392_v44  ;;  %v1297_v42 = vmov 0.0   ;;  %v669_v44 = vld [vmem:[#allocation6 + $0x70] sm:$0xff]  ;;  %v670_v45 = vld [vmem:[#allocation6 + $0x78] sm:$0xff] }
  0xfc   : > { %v419_v7 = vsel %vm331_vm8, 0, %v417_v5  ;;  %980 = vmatprep.mubr.msk.f32.mxu1 %vm1296_vm0, %v1297_v42 }
  0xfd   : > { %v396_v47 = vsub.s32 0, %v394_v46  ;;  %v526_v8 = vadd.s32 3, %v419_v7  ;;  %v423_v10 = vand.u32 3, %v419_v7 }
  0xff   : > { %v882_v48 = vmin.u32 %v396_v47, %v394_v46  ;;  %v527_v9 = vand.u32 3, %v526_v8  ;;  %vm428_vm10 = vcmp.eq.s32.totalorder %v423_v10, 2  ;;  %vm425_vm12 = vcmp.eq.s32.totalorder %v423_v10, 0 }
 0x100   : > { %vm424_vm14 = vcmp.lt.s32.totalorder %v423_v10, 2 }
 0x101   : > { %v398_v49 = vclz %v882_v48  ;;  %vm532_vm9 = vcmp.eq.s32.totalorder %v527_v9, 2  ;;  %vm529_vm11 = vcmp.eq.s32.totalorder %v527_v9, 0  ;;  %vm528_vm13 = vcmp.lt.s32.totalorder %v527_v9, 2  ;;  %v889_v48 = vld [vmem:[%s1554_s3] ss:$0 sm:$0xff] }
 0x103   : > { %v883_v50 = vadd.s32 4294967294, %v398_v49 }
 0x105   : > { %vm884_vm6 = vcmp.lt.s32.totalorder %v883_v50, 0 }
 0x106   : > { %v401_v51 = vsel %vm884_vm6, 0, %v883_v50 }
 0x107   : > { %v402_v55 = vsub.s32 32, %v401_v51  ;;  %v406_v56 = vsub.s32 4294967266, %v401_v51  ;;  %v403_v57 = vshll.u32 %v394_v46, %v401_v51  ;;  %v1037_v46 = vpack.c.bf16 %v670_v45, %v669_v44 }
 0x109   : > { %v404_v58 = vshrl.u32 %v386_v53, %v402_v55  ;;  %v407_v59 = vadd.s32 127, %v406_v56 }
 0x10b   : > { %v405_v60 = vor.u32 %v404_v58, %v403_v57  ;;  %v408_v61 = vshll.u32 %v407_v59, 23  ;;  %v891_v59 = vld [vmem:[%s1556_s5] ss:$0 sm:$0xff] }
 0x10d   : > { %v409_v62 = vor.u32 4788187, %v408_v61  ;;  %v412_v0 = vcvt.s32.f32 %v405_v60 }
 0x10f   : > { %v410_v63 = vand.u32 2147483647, %v409_v62 }
 0x111   : > { %v413_v1 = vmul.f32 %v412_v0, %v410_v63 }
 0x113   : > { %v414_v3 = vxor.u32 2147483648, %v413_v1 }
 0x115   : > { %v415_v4 = vsel %vm332_vm7, %v414_v3, %v413_v1 }
 0x116   : > { %v418_v6 = vsel %vm331_vm8, %v1472_v52, %v415_v4  ;;  %v660_v52 = vld [vmem:[#allocation6 + $0x28] sm:$0xff] }
 0x117   : > { %1132 = vcosq.f32 %v418_v6  ;;  %v1022_v30 = vpack.c.bf16 %v660_v52, %v659_v29 }
 0x118   : > { %1134 = vsinq.f32 %v418_v6 }
 0x119   : > { %1023 = vmatpush3.bf16.msra.mxu1 %v1022_v30 }
 0x11a   : > { %1024 = vmatprep.subr.bf16.mxu1 %v1295_v25 }
 0x11d   : > { %1026 = vmatpush3.bf16.msra.mxu1 %v1025_v33 }
 0x11e   : > { %1027 = vmatprep.subr.bf16.mxu1 %v1295_v25 }
 0x121   : > { %v1133_v11 = vpop.eup %1132  ;;  %1029 = vmatpush3.bf16.msra.mxu1 %v1028_v36 }
 0x122   : > { %v1135_v12 = vpop.eup %1134  ;;  %v429_v13 = vxor.u32 2147483648, %v1133_v11  ;;  %1030 = vmatprep.subr.bf16.mxu1 %v1295_v25 }
 0x123   : > { %v426_v14 = vxor.u32 2147483648, %v1135_v12 }
 0x124   : > { %v534_v15 = vsel %vm532_vm9, %v429_v13, %v1135_v12  ;;  %v430_v54 = vsel %vm428_vm10, %v429_v13, %v1135_v12 }
 0x125   : > { %v531_v16 = vsel %vm529_vm11, %v1133_v11, %v426_v14  ;;  %v427_v17 = vsel %vm425_vm12, %v1133_v11, %v426_v14  ;;  %1032 = vmatpush3.bf16.msra.mxu1 %v1031_v39 }
 0x126   : > { %v535_v18 = vsel %vm528_vm13, %v531_v16, %v534_v15  ;;  %v431_v19 = vsel %vm424_vm14, %v427_v17, %v430_v54  ;;  %1033 = vmatprep.subr.bf16.mxu1 %v1295_v25 }
 0x127   : > { %v536_v20 = vsel %vm422_vm15, nan, %v535_v18  ;;  %v432_v21 = vsel %vm422_vm15, nan, %v431_v19 }
 0x128   : > { %640 = vmatprep.mubr.f32.mxu0 %v536_v20 }
 0x129   : > { %641 = vmatmul.mubr.f32.vlgmr.msra.gmra.mrb[0].mxu0 %v432_v21  ;;  %1035 = vmatpush3.bf16.msra.mxu1 %v1034_v43 }
 0x12a   : > { %1036 = vmatprep.subr.bf16.mxu1 %v1295_v25 }
 0x12d   : > { %1038 = vmatpush3.bf16.msra.mxu1 %v1037_v46 }
 0x1fc   : > { %v928_v47 = vpop.f32.mrb[0].mxu0 }
 0x1fd   : > { %v929_v49 = vpop.f32.mrb[1].mxu0 }
 0x1fe   : > { %v930_v50 = vadd.f32 %v929_v49, %v928_v47 }
 0x200   : > { %v643_v51 = vadd.f32 %v930_v50, %v889_v48 }
 0x202   : > { %v890_v53 = vmul.f32 -1.442695, %v643_v51 }
 0x204   : > { %1136 = vpow2.f32 %v890_v53 }
 0x20e   : > { %v1137_v55 = vpop.eup %1136 }
 0x20f   : > { %v649_v56 = vadd.f32 1.0, %v1137_v55 }
 0x211   : > { %1138 = vrcp.f32 %v649_v56 }
 0x21b   : > { %v1139_v57 = vpop.eup %1138 }
 0x21c   : > { %v652_v58 = vmul.f32 %v1139_v57, %v643_v51 }
 0x21e   : > { %981 = vmatmul.mubr.f32.vlgmr.msra.gmra.mrb[0].mxu1 %v652_v58 }
 0x2f1   : > { %v744_v60 = vpop.f32.mrb[0].mxu1 }
 0x2f2   : > { %v745_v61 = vadd.f32 %v891_v59, %v744_v60  ;;  %v982_v62 = vpop.f32.mrb[1].mxu1 }
 0x2f4   : > { %748 = vst [vmem:[%s304_s25] sm:$0xff] %v745_v61 }
 0x2f5   : > { %1209 = shalt.err (!%p1206_p6)
}
 0x2f6   : > { %s1210_s20 = scalar_lea.hbm %s1504_s17, 128  ;;  %s1214_s30 = scalar_lea.hbm %s1557_s6, 256 }
 0x2f7   : > { %p1211_p7 = scmp.ne.s32.totalorder %s1504_s17, %s1210_s20  ;;  %p1215_p0 = scmp.lt.u32.totalorder %s1504_s17, %s1557_s6 }
 0x2f8   : > { %p1216_p4 = scmp.lt.u32.totalorder %s1214_s30, %s1210_s20  ;;  %p1218_p13 = scmp.lt.u32.totalorder %s1210_s20, %s1504_s17 }
 0x2f9   : > { %p1212_p9 = pnand %p1211_p7, %p1573_p8 }
 0x2fa   : > { %p1217_p1 = por %p1216_p4, %p1215_p0 }
 0x2fb   : > { %p1213_p12 = pneg %p1212_p9 }
 0x2fc   : > { %p1219_p10 = por %p1218_p13, %p1217_p1 }
 0x2fe   : > { %p1220_p11 = pnand %p1219_p10, %p1213_p12 }
 0x300   : > { %1223 = shalt.err (!%p1220_p11)
}
 0x301   : > { %1051 = dma.vmem_to_hbm [thread:$0]  (%p1573_p8), %s1506_s29, 128, %s1504_s17, %s750_s16  }
 0x302 PF: > { %p1068_p2 = scmp.ge.s32.totalorder %s1282_s26, 2  ;;  %s776_s14 = sand.u32 1, %s1262_s21  }
 0x303   : > { %p1574_p3 = scmp.ne.s32.totalorder %s1567_s9, 0  ;;  %s777_s25 = scalar_lea.sflag [#allocation5], %s776_s14 }
 0x305   : > { %p1061_p5 = pnand %p1068_p2, %p1574_p3 }
 0x307   : > { %1257 = dma.done.wait (!%p1061_p5), %s777_s25, 128  }
 0x308   : > { %1259 = vsyncadd (!%p1061_p5), %s777_s25, 4294967168  ;;  %s21_s26 = sadd.s32 1, %s1282_s26   ;;  %s1575_s24 = sld [smem:[#allocation12_spill]] }
 0x309   : > { %p18_p6 = scmp.ge.s32.totalorder %s21_s26, 4   ;;  %s1576_s25 = sld [smem:[#allocation13_spill]] }
 0x30a   : > { %s1577_s21 = smov %s1266_s22  ;;  %s1578_s22 = smov %s1270_s23 }
 0x30b   : > { %s1579_s23 = smov %s1387_s10  ;;  %20 = sbr.rel (!%p18_p6) target bundleno = 6 (0x6), region = 96 }
 0x312   :  { %782 = vsyncpa [#allocation4], 1 }
 0x313   :  { %784 = vsyncpa [#allocation4 + $0x1], 1 }
 0x314   :  { %785 = vsyncpa [#allocation7], 1 }
 0x315   :  { %786 = vsyncpa [#allocation5], 1 }
 0x316   :  { %788 = vsyncpa [#allocation5 + $0x1], 1 }

</bundles_post_ra>
